<compile_context>
chip_gen: v5e
topology: v5e:2x2
jax: 0.10.0
libtpu: 0.0.40
codegen_flags: <defaults>
</compile_context>

<pallas_src>
import functools

import jax
import jax.numpy as jnp
import numpy as np
from jax.experimental import pallas as pl
from jax.experimental.pallas import tpu as pltpu

LEAKY_SLOPE = 0.2
BN_EPS = 1e-5
KH = KW = 4
LANE = 128
SUBLANE = 8
FUSED_BLOCK_VMEM_BYTES = 4 * 1024 * 1024   # single-shot fused CNNBlock threshold


def _round_up(x, m):
    return ((x + m - 1) // m) * m


def _pad_to(x, shape):
    return jnp.pad(x, [(0, s - d) for d, s in zip(x.shape, shape)])


# ----------------------------------------------------------------------------
# Kernel 1: single-K-step matmul with fused bias (+ optional LeakyReLU)
#   grid = (M tiles, N tiles), both parallel; no K axis, no accumulator scratch.
# ----------------------------------------------------------------------------
def matmul_bias_kernel(a_ref, b_ref, bias_ref, o_ref, *, fuse_leaky):
    out = jnp.dot(a_ref[...], b_ref[...], preferred_element_type=jnp.float32)
    out = out + bias_ref[...]                      # (1, tn) broadcast over rows
    if fuse_leaky:
        out = jnp.where(out >= 0, out, LEAKY_SLOPE * out)
    o_ref[...] = out


def matmul_bias_act(a, b, bias, *, fuse_leaky, tn=LANE):
    """a:(M,K) f32, b:(K,N) f32, bias:(N,). Returns zero-padded (Mp,Np) f32."""
    M, K = a.shape
    _, N = b.shape
    tm = min(512, _round_up(M, SUBLANE))
    Mp, Kp, Np = _round_up(M, tm), _round_up(K, LANE), _round_up(N, tn)
    a_p = _pad_to(a, (Mp, Kp)).astype(jnp.bfloat16)
    b_p = _pad_to(b, (Kp, Np)).astype(jnp.bfloat16)
    bias_p = _pad_to(bias.reshape(1, -1), (1, Np)).astype(jnp.float32)

    kern = functools.partial(matmul_bias_kernel, fuse_leaky=fuse_leaky)
    return pl.pallas_call(
        kern,
        out_shape=jax.ShapeDtypeStruct((Mp, Np), jnp.float32),
        grid_spec=pltpu.PrefetchScalarGridSpec(
            num_scalar_prefetch=0,
            grid=(Mp // tm, Np // tn),
            in_specs=[pl.BlockSpec((tm, Kp), lambda i, j: (i, 0)),
                      pl.BlockSpec((Kp, tn), lambda i, j: (0, j)),
                      pl.BlockSpec((1, tn), lambda i, j: (0, j))],
            out_specs=pl.BlockSpec((tm, tn), lambda i, j: (i, j))),
        compiler_params=pltpu.CompilerParams(
            dimension_semantics=("parallel", "parallel")),
    )(a_p, b_p, bias_p)


# ----------------------------------------------------------------------------
# Kernel 2: fully fused CNNBlock layer (single invocation):
#   conv matmul -> batch stats -> folded BN affine -> LeakyReLU(0.2).
#   Padded A rows / B cols are zero (conv is bias-free), so they add 0 to the
#   sums; we divide by the true row count m_rows.
# ----------------------------------------------------------------------------
def fused_block_kernel(a_ref, b_ref, gamma_ref, beta_ref, o_ref, *, m_rows):
    acc = jnp.dot(a_ref[...], b_ref[...], preferred_element_type=jnp.float32)
    inv_m = 1.0 / m_rows
    mean = jnp.sum(acc, axis=0, keepdims=True) * inv_m
    var = jnp.maximum(jnp.sum(acc * acc, axis=0, keepdims=True) * inv_m
                      - mean * mean, 0.0)           # clamp fp cancellation
    scale = gamma_ref[...] * jax.lax.rsqrt(var + BN_EPS)
    shift = beta_ref[...] - mean * scale
    y = acc * scale + shift
    o_ref[...] = jnp.where(y >= 0, y, LEAKY_SLOPE * y)


def fused_cnn_block(a, b, gamma, beta):
    M, K = a.shape
    _, N = b.shape
    Mp, Kp, Np = _round_up(M, SUBLANE), _round_up(K, LANE), _round_up(N, LANE)
    a_p = _pad_to(a, (Mp, Kp)).astype(jnp.bfloat16)
    b_p = _pad_to(b, (Kp, Np)).astype(jnp.bfloat16)
    gamma_p = _pad_to(gamma.reshape(1, -1), (1, Np)).astype(jnp.float32)
    beta_p = _pad_to(beta.reshape(1, -1), (1, Np)).astype(jnp.float32)

    kern = functools.partial(fused_block_kernel, m_rows=float(M))
    return pl.pallas_call(
        kern,
        out_shape=jax.ShapeDtypeStruct((Mp, Np), jnp.float32),
        grid_spec=pltpu.PrefetchScalarGridSpec(
            num_scalar_prefetch=0,
            grid=(1,),
            in_specs=[pl.BlockSpec((Mp, Kp), lambda i: (0, 0)),
                      pl.BlockSpec((Kp, Np), lambda i: (0, 0)),
                      pl.BlockSpec((1, Np), lambda i: (0, 0)),
                      pl.BlockSpec((1, Np), lambda i: (0, 0))],
            out_specs=pl.BlockSpec((Mp, Np), lambda i: (0, 0))),
        compiler_params=pltpu.CompilerParams(
            dimension_semantics=("arbitrary",)),
    )(a_p, b_p, gamma_p, beta_p)


# ----------------------------------------------------------------------------
# Fallback (large layers): matmul with BN statistics fused into its epilogue
# (sum / sumsq accumulated in VMEM scratch across M tiles), then a separate
# scale/shift + LeakyReLU elementwise kernel.
# ----------------------------------------------------------------------------
def matmul_stats_kernel(a_ref, b_ref, o_ref, sum_ref, sq_ref, acc_sum, acc_sq):
    i = pl.program_id(0)

    @pl.when(i == 0)
    def _():
        acc_sum[...] = jnp.zeros_like(acc_sum)
        acc_sq[...] = jnp.zeros_like(acc_sq)

    out = jnp.dot(a_ref[...], b_ref[...], preferred_element_type=jnp.float32)
    acc_sum[...] += jnp.sum(out, axis=0, keepdims=True)
    acc_sq[...] += jnp.sum(out * out, axis=0, keepdims=True)
    o_ref[...] = out

    @pl.when(i == pl.num_programs(0) - 1)
    def _():
        sum_ref[...] = acc_sum[...]
        sq_ref[...] = acc_sq[...]


def bn_act_kernel(x_ref, scale_ref, shift_ref, o_ref):
    y = x_ref[...] * scale_ref[...] + shift_ref[...]
    o_ref[...] = jnp.where(y >= 0, y, LEAKY_SLOPE * y)


def matmul_stats_bn_act(a, b, gamma, beta, *, tm=512):
    M, K = a.shape
    _, N = b.shape
    tm = min(tm, _round_up(M, SUBLANE))
    Mp, Kp, Np = _round_up(M, tm), _round_up(K, LANE), _round_up(N, LANE)
    a_p = _pad_to(a, (Mp, Kp)).astype(jnp.bfloat16)
    b_p = _pad_to(b, (Kp, Np)).astype(jnp.bfloat16)

    out_p, sums, sqs = pl.pallas_call(
        matmul_stats_kernel,
        out_shape=(jax.ShapeDtypeStruct((Mp, Np), jnp.float32),
                   jax.ShapeDtypeStruct((1, Np), jnp.float32),
                   jax.ShapeDtypeStruct((1, Np), jnp.float32)),
        grid_spec=pltpu.PrefetchScalarGridSpec(
            num_scalar_prefetch=0,
            grid=(Mp // tm,),
            in_specs=[pl.BlockSpec((tm, Kp), lambda i: (i, 0)),
                      pl.BlockSpec((Kp, Np), lambda i: (0, 0))],
            out_specs=(pl.BlockSpec((tm, Np), lambda i: (i, 0)),
                       pl.BlockSpec((1, Np), lambda i: (0, 0)),
                       pl.BlockSpec((1, Np), lambda i: (0, 0))),
            scratch_shapes=[pltpu.VMEM((1, Np), jnp.float32),
                            pltpu.VMEM((1, Np), jnp.float32)]),
        compiler_params=pltpu.CompilerParams(
            dimension_semantics=("arbitrary",)),
    )(a_p, b_p)

    mean = sums / M
    var = jnp.maximum(sqs / M - mean * mean, 0.0)
    gamma_p = _pad_to(gamma.reshape(1, -1), (1, Np)).astype(jnp.float32)
    beta_p = _pad_to(beta.reshape(1, -1), (1, Np)).astype(jnp.float32)
    scale = gamma_p * jax.lax.rsqrt(var + BN_EPS)
    shift = beta_p - mean * scale

    return pl.pallas_call(
        bn_act_kernel,
        out_shape=jax.ShapeDtypeStruct((Mp, Np), jnp.float32),
        grid_spec=pltpu.PrefetchScalarGridSpec(
            num_scalar_prefetch=0,
            grid=(Mp // tm,),
            in_specs=[pl.BlockSpec((tm, Np), lambda i: (i, 0)),
                      pl.BlockSpec((1, Np), lambda i: (0, 0)),
                      pl.BlockSpec((1, Np), lambda i: (0, 0))],
            out_specs=pl.BlockSpec((tm, Np), lambda i: (i, 0))),
        compiler_params=pltpu.CompilerParams(
            dimension_semantics=("parallel",)),
    )(out_p, scale, shift)


# ----------------------------------------------------------------------------
# Conv2d = (reflect pad) + NHWC im2col + Pallas matmul.  No per-layer NCHW<->NHWC
# transposes: the matmul output rows already come back in NHWC order.
# ----------------------------------------------------------------------------
def _im2col_nhwc(x, stride):
    """x:(N,H,W,C) -> (N*Hout*Wout, KH*KW*C); column order (kh, kw, c), c fastest."""
    N, H, W, C = x.shape
    Hout = (H - KH) // stride + 1
    Wout = (W - KW) // stride + 1
    cols = []
    for ki in range(KH):
        for kj in range(KW):
            cols.append(x[:, ki:ki + stride * Hout:stride,
                          kj:kj + stride * Wout:stride, :])
    p = jnp.stack(cols, axis=3)                    # (N, Hout, Wout, KH*KW, C)
    return p.reshape(N * Hout * Wout, KH * KW * C), Hout, Wout


def _weight_to_matrix(w):
    """(Cout,Cin,KH,KW) -> (KH*KW*Cin, Cout) matching (kh, kw, cin) patch order."""
    cout, cin = w.shape[0], w.shape[1]
    return w.transpose(2, 3, 1, 0).reshape(KH * KW * cin, cout)


def conv_bias_act(x_nhwc, w, bias, *, stride, padding, fuse_leaky):
    N = x_nhwc.shape[0]
    if padding > 0:
        x_nhwc = jnp.pad(x_nhwc, ((0, 0), (padding, padding),
                                  (padding, padding), (0, 0)), mode='reflect')
    a, Hout, Wout = _im2col_nhwc(x_nhwc, stride)
    b = _weight_to_matrix(w)
    Cout = w.shape[0]
    out_p = matmul_bias_act(a, b, bias, fuse_leaky=fuse_leaky)
    M = N * Hout * Wout
    return out_p[:M, :Cout].reshape(N, Hout, Wout, Cout)


def conv_bn_act(x_nhwc, w, gamma, beta, *, stride):
    N = x_nhwc.shape[0]
    a, Hout, Wout = _im2col_nhwc(x_nhwc, stride)   # CNNBlock conv has padding=0
    b = _weight_to_matrix(w)
    Cout = w.shape[0]
    M, K = a.shape
    Mp, Kp, Np = _round_up(M, SUBLANE), _round_up(K, LANE), _round_up(Cout, LANE)
    est_bytes = (Mp * Kp + Kp * Np) * 2 + Mp * Np * 4
    if est_bytes <= FUSED_BLOCK_VMEM_BYTES:
        out_p = fused_cnn_block(a, b, gamma, beta)          # single fused kernel
    else:
        out_p = matmul_stats_bn_act(a, b, gamma, beta)      # large-shape fallback
    return out_p[:M, :Cout].reshape(N, Hout, Wout, Cout)


# ----------------------------------------------------------------------------
# Discriminator forward (external NCHW, internal NHWC)
# ----------------------------------------------------------------------------
def discriminator_forward(params, x, y):
    h = jnp.concatenate([jnp.transpose(x, (0, 2, 3, 1)),
                         jnp.transpose(y, (0, 2, 3, 1))], axis=-1)

    p = params['initial']
    h = conv_bias_act(h, p['w'], p['b'], stride=2, padding=1, fuse_leaky=True)

    for blk in params['blocks']:
        h = conv_bn_act(h, blk['w'], blk['gamma'], blk['beta'],
                        stride=blk['stride'])

    p = params['final']
    h = conv_bias_act(h, p['w'], p['b'], stride=1, padding=1, fuse_leaky=False)
    return jnp.transpose(h, (0, 3, 1, 2))          # back to NCHW


# ----------------------------------------------------------------------------
# Pure-JAX f32 reference (correctness check)
# ----------------------------------------------------------------------------
def reference_forward(params, x, y):
    def conv(v, w, b, stride, padding):
        if padding > 0:
            v = jnp.pad(v, ((0, 0), (0, 0), (padding, padding), (padding, padding)),
                        mode='reflect')
        out = jax.lax.conv_general_dilated(
            v, w, (stride, stride), 'VALID',
            dimension_numbers=('NCHW', 'OIHW', 'NCHW'),
            precision=jax.lax.Precision.HIGHEST)
        if b is not None:
            out = out + b.reshape(1, -1, 1, 1)
        return out

    def leaky(v):
        return jnp.where(v >= 0, v, LEAKY_SLOPE * v)

    def bn(v, gamma, beta):
        mean = jnp.mean(v, axis=(0, 2, 3), keepdims=True)
        var = jnp.mean((v - mean) ** 2, axis=(0, 2, 3), keepdims=True)
        return ((v - mean) * jax.lax.rsqrt(var + BN_EPS)
                * gamma.reshape(1, -1, 1, 1) + beta.reshape(1, -1, 1, 1))

    h = jnp.concatenate([x, y], axis=1)
    h = leaky(conv(h, params['initial']['w'], params['initial']['b'], 2, 1))
    for blk in params['blocks']:
        h = leaky(bn(conv(h, blk['w'], None, blk['stride'], 0),
                     blk['gamma'], blk['beta']))
    return conv(h, params['final']['w'], params['final']['b'], 1, 1)


# ----------------------------------------------------------------------------
# Deterministic parameter construction
# ----------------------------------------------------------------------------
def make_params(key, in_channels, features):
    def conv_w(k, cout, cin):
        return 0.05 * jax.random.normal(k, (cout, cin, KH, KW), jnp.float32)

    n_keys = 4 + 3 * (len(features) - 1)
    keys = jax.random.split(key, n_keys)
    ki = iter(range(n_keys))

    params = {}
    params['initial'] = {
        'w': conv_w(keys[next(ki)], features[0], in_channels * 2),
        'b': 0.05 * jax.random.normal(keys[next(ki)], (features[0],), jnp.float32),
    }
    blocks = []
    cin = features[0]
    for feat in features[1:]:
        blocks.append({
            'w': conv_w(keys[next(ki)], feat, cin),
            'gamma': 1.0 + 0.1 * jax.random.normal(keys[next(ki)], (feat,), jnp.float32),
            'beta': 0.1 * jax.random.normal(keys[next(ki)], (feat,), jnp.float32),
            'stride': 1 if feat == features[-1] else 2,   # mirrors the PyTorch rule
        })
        cin = feat
    params['blocks'] = blocks
    params['final'] = {
        'w': conv_w(keys[next(ki)], 1, cin),
        'b': 0.05 * jax.random.normal(keys[next(ki)], (1,), jnp.float32),
    }
    return params


if __name__ == "__main__":
    key = jax.random.PRNGKey(0)
    k_param, k_x, k_y = jax.random.split(key, 3)

    in_channels = 3
    features = [8, 16, 32, 64]   # scaled-down analogue of [64, 128, 256, 512]
    batch, spatial = 2, 64       # smallest spatial that survives the pad-0 blocks

    params = make_params(k_param, in_channels, features)
    x = jax.random.normal(k_x, (batch, in_channels, spatial, spatial), jnp.float32)
    y = jax.random.normal(k_y, (batch, in_channels, spatial, spatial), jnp.float32)

    out = jax.block_until_ready(discriminator_forward(params, x, y))
    ref = jax.block_until_ready(reference_forward(params, x, y))

    assert out.shape == (batch, 1, 2, 2), out.shape
    # MXU inputs are bf16 (f32 accumulation); tolerance set accordingly vs f32 ref.
    np.testing.assert_allclose(np.asarray(out), np.asarray(ref),
                               rtol=3e-2, atol=3e-2)
    print("KERNEL_OK")
</pallas_src>

<mosaic_0001>
module attributes {stable_mosaic.version = 11 : i64} {
  func.func @matmul_bias_kernel(%arg0: i32, %arg1: i32, %arg2: memref<512x128xbf16, #tpu.memory_space<vmem>>, %arg3: memref<128x128xbf16, #tpu.memory_space<vmem>>, %arg4: memref<1x128xf32, #tpu.memory_space<vmem>>, %arg5: memref<512x128xf32, #tpu.memory_space<vmem>>) attributes {dimension_semantics = [#tpu.dimension_semantics<parallel>, #tpu.dimension_semantics<parallel>], iteration_bounds = array<i64: 4, 1>, scalar_prefetch = 0 : i64, scratch_operands = 0 : i64, tpu.core_type = #tpu.core_type<tc>, window_params = [{transform_indices = @transform_0, window_bounds = array<i64: 512, 128>}, {transform_indices = @transform_1, window_bounds = array<i64: 128, 128>}, {transform_indices = @transform_2, window_bounds = array<i64: 1, 128>}, {transform_indices = @transform_3, window_bounds = array<i64: 512, 128>}]} {
    %c0 = arith.constant 0 : index
    %c0_0 = arith.constant 0 : index
    %0 = vector.load %arg2[%c0, %c0_0] : memref<512x128xbf16, #tpu.memory_space<vmem>>, vector<512x128xbf16>
    %c0_1 = arith.constant 0 : index
    %c0_2 = arith.constant 0 : index
    %1 = vector.load %arg3[%c0_1, %c0_2] : memref<128x128xbf16, #tpu.memory_space<vmem>>, vector<128x128xbf16>
    %cst = arith.constant dense<0.000000e+00> : vector<512x128xf32>
    %2 = tpu.matmul %0, %1, %cst {dimension_numbers = #tpu.dot_dimension_numbers<[1], [0], [0], [1], [0, 0, 1, 1], [], []>} : vector<512x128xbf16>, vector<128x128xbf16>, vector<512x128xf32> -> vector<512x128xf32>
    %c0_3 = arith.constant 0 : index
    %c0_4 = arith.constant 0 : index
    %3 = vector.load %arg4[%c0_3, %c0_4] : memref<1x128xf32, #tpu.memory_space<vmem>>, vector<1x128xf32>
    %4 = vector.broadcast %3 : vector<1x128xf32> to vector<512x128xf32>
    %5 = arith.addf %2, %4 : vector<512x128xf32>
    %cst_5 = arith.constant 0.000000e+00 : f32
    %6 = vector.broadcast %cst_5 : f32 to vector<512x128xf32>
    %7 = arith.cmpf oge, %5, %6 : vector<512x128xf32>
    %cst_6 = arith.constant 2.000000e-01 : f32
    %8 = vector.broadcast %cst_6 : f32 to vector<512x128xf32>
    %9 = arith.mulf %8, %5 : vector<512x128xf32>
    %10 = arith.select %7, %5, %9 : vector<512x128xi1>, vector<512x128xf32>
    %c0_7 = arith.constant 0 : index
    %c0_8 = arith.constant 0 : index
    %11 = vector.load %arg5[%c0_7, %c0_8] : memref<512x128xf32, #tpu.memory_space<vmem>>, vector<512x128xf32>
    tpu.vector_store %arg5[%c0_7, %c0_8], %10 {strides = array<i32>} : memref<512x128xf32, #tpu.memory_space<vmem>>, vector<512x128xf32>,
    return
  }
  func.func @transform_0(%arg0: i32, %arg1: i32) -> (i32, i32) {
    %c0_i32 = arith.constant 0 : i32
    %c0_i32_0 = arith.constant 0 : i32
    return %arg0, %c0_i32 : i32, i32
  }
  func.func @transform_1(%arg0: i32, %arg1: i32) -> (i32, i32) {
    %c0_i32 = arith.constant 0 : i32
    %c0_i32_0 = arith.constant 0 : i32
    return %c0_i32, %arg1 : i32, i32
  }
  func.func @transform_2(%arg0: i32, %arg1: i32) -> (i32, i32) {
    %c0_i32 = arith.constant 0 : i32
    %c0_i32_0 = arith.constant 0 : i32
    return %c0_i32, %arg1 : i32, i32
  }
  func.func @transform_3(%arg0: i32, %arg1: i32) -> (i32, i32) {
    %c0_i32 = arith.constant 0 : i32
    return %arg0, %arg1 : i32, i32
  }
}

</mosaic_0001>

<bundles_post_ra>
// kernel: tpu_custom_call.1
= control target key start
LH: loop header
LB: loop body
LE: loop exit
PB: predicated region body
PF: predicated region fallthrough
CT: control target
= control target key end

     0   :  { %s1937_s0 = inlined_call_operand.hbm [shape: bf16[2048,128], index: 0, kind: input, shape index: {}]   ;;  %s1938_s1 = inlined_call_operand.hbm [shape: bf16[128,128], index: 1, kind: input, shape index: {}]   ;;  %s1939_s2 = inlined_call_operand.vmem [shape: f32[1,128], index: 2, kind: input, shape index: {}]   ;;  %s1940_s3 = inlined_call_operand.hbm [shape: f32[2048,128], index: 3, kind: output, shape index: {}]  }
   0x1   :  { %1942 = sst [smem:[#allocation11_spill]] %s1938_s1 }
   0x2   :  { %8 = vsyncpa [#allocation3], 0 }
   0x3   :  { %10 = vsyncpa [#allocation3 + $0x1], 0 }
   0x4   :  { %11 = vsyncpa [#allocation6], 0 }
   0x5   :  { %12 = vsyncpa [#allocation4], 0 }
   0x6   :  { %14 = vsyncpa [#allocation4 + $0x1], 0  ;;  %s1613_s12 = smov 0   ;;  %s1615_s13 = smov 0  }
   0x7   :  { %s1617_s14 = smov 0   ;;  %s1619_s15 = smov 0  }
   0x8   :  { %s1621_s16 = smov 0   ;;  %s1623_s17 = smov 0  }
   0x9 LB: > { %s1118_s18 = sadd.s32 4294967295, %s1586_s17   ;;  %s1119_s19 = sadd.s32 4294967294, %s1586_s17   ;;  %s1586_s17 = sphi %s1623_s17, %s20_s17   ;;  %s1582_s16 = sphi %s1621_s16, %s1956_s16   ;;  %s1578_s15 = sphi %s1619_s15, %s1955_s15   ;;  %s1574_s14 = sphi %s1617_s14, %s1954_s14   ;;  %s1570_s13 = sphi %s1615_s13, %s1953_s13   ;;  %s1566_s12 = sphi %s1613_s12, %s1952_s12  }
   0xa   : > { %p52_p0 = scmp.ne.s32.totalorder %s1570_s13, %s1566_s12  ;;  %p1647_p1 = scmp.eq.s32.totalorder %s1118_s18, 0 }
   0xb   : > { %p1651_p2 = scmp.eq.s32.totalorder %s1118_s18, 3  ;;  %p136_p3 = scmp.eq.s32.totalorder %s1119_s19, 3 }
   0xc   : > { %p1657_p4 = por %p1647_p1, %p52_p0  ;;  %p1120_p5 = scmp.ge.s32.totalorder %s1586_s17, 1 }
   0xd   : > { %p1662_p6 = por %p136_p3, %p52_p0  ;;  %p143_p7 = scmp.lt.s32.totalorder %s1586_s17, 5 }
   0xe   : > { %s1947_s1 = sld [smem:[#allocation11_spill]]  ;;  %s1588_s28 = smov [#allocation5]  }
   0xf   : > { %p1670_p8 = pnand %p1120_p5, %p143_p7  ;;  %s158_s29 = sshll.u32 %s1588_s28, 4  ;;  %s159_s29 = int_to_ptr.vmem [resolvable:$true] %s158_s29 }
  0x10   : > { %s1941_s30 = smov 64   ;;  %s1590_s4 = smov 4  }
  0x11   : > { %p1370_p9 = pneg %p1670_p8  ;;  %s32_s5 = sadd.s32 1, %s1582_s16 }
  0x12   : > { %p34_p11 = scmp.ge.s32.totalorder %s32_s5, 4  ;;  %s39_s6 = sadd.s32 1, %s1574_s14 }
  0x13   : > { %p1371_p10 = pnand %p1370_p9, %p1647_p1  ;;  %p46_p12 = scmp.ne.s32.totalorder %s1574_s14, %s1570_s13 }
  0x14   : > { %s156_s26 = sshll.u32 %s1947_s1, 4  ;;  %p47_p13 = scmp.eq.s32.totalorder %s1586_s17, 0  ;;  %s157_s26 = int_to_ptr.hbm [resolvable:$true] %s156_s26 }
  0x15   : > { %1373 = dma.hbm_to_vmem [thread:$0]  (!%p1371_p10), %s157_s26, 1024, %s159_s29, [#allocation6], %s1941_s30, %s1941_s30, %s1590_s4  }
  0x16   : > { %s1958_s5 = smov (%p34_p11, %s32_s5), 0  ;;  %p1688_p0 = por %p47_p13, %p46_p12 }
  0x17   : > { %p1694_p3 = por %p1651_p2, %p46_p12  ;;  %s36_s9 = ssub.s32 %s1582_s16, %s1958_s5 }
  0x18   : > { %p1383_p5 = scmp.lt.s32.totalorder %s1586_s17, 4  ;;  %p37_p7 = scmp.eq.s32.totalorder %s36_s9, 0 }
  0x19   : > { %s178_s10 = sand.u32 1, %s1574_s14   ;;  %s1296_s19 = sshll.u32 %s1582_s16, 8 }
  0x1a   : > { %s1124_s11 = sshll.u32 %s178_s10, 8  ;;  %s187_s26 = scalar_lea.hbm %s1937_s0, %s1296_s19 }
  0x1b   : > { %s1703_s18 = scalar_select %p37_p7, %s1574_s14, %s39_s6  }
  0x1c   : > { %s182_s28 = scalar_lea.vmem [#allocation2], %s1124_s11  ;;  %s188_s21 = sshll.u32 %s187_s26, 4  ;;  %s189_s21 = int_to_ptr.hbm [resolvable:$true] %s188_s21 }
  0x1d   : > { %s190_s29 = sshll.u32 %s182_s28, 4  ;;  %p1375_p2 = pnand %p1383_p5, %p1688_p0  ;;  %s191_s29 = int_to_ptr.vmem [resolvable:$true] %s190_s29 }
  0x1e   : > { %s179_s30 = scalar_lea.sflag [#allocation3], %s178_s10  ;;  %s1951_s1 = smov 64  }
  0x1f   : > { %1377 = dma.hbm_to_vmem [thread:$0]  (!%p1375_p2), %s189_s21, 4096, %s191_s29, %s179_s30, %s1951_s1, %s1951_s1, %s1590_s4  }
  0x20   : > { %202 = sbr.rel (%p1670_p8) target bundleno = 335 (0x14f), region = 32  ;;  %s1717_s6 = sand.u32 (!%p1670_p8), 1, %s1570_s13  }
  0x21   : > { %s1128_s9 = sshll.u32 (!%p1670_p8), %s1717_s6, 8  ;;  %s205_s11 = scalar_lea.sflag (!%p1670_p8), [#allocation3], %s1717_s6 }
  0x22   : > { %s1721_s19 = scalar_lea.vmem (!%p1670_p8), [#allocation2], %s1128_s9 }
  0x25   : > { %1553 = dma.done.wait (%p1657_p4), %s205_s11, 4096  }
  0x26   : > { %1555 = vsyncadd (%p1657_p4), %s205_s11, 4294963200 }
  0x27   : > { %1557 = dma.done.wait (%p1647_p1), [#allocation6], 1024  }
  0x28   : > { %1559 = vsyncadd (%p1647_p1), [#allocation6], 4294966272  ;;  %v1336_v0 = vld [vmem:[#allocation5 + $0x38] sm:$0xff]  ;;  %v1335_v1 = vld [vmem:[#allocation5 + $0x30] sm:$0xff]  ;;  %s1130_s22 = sshll.u32 %s1717_s6, 9  ;;  %s1337_s30 = sshll.u32 %s1578_s15, 9 }
  0x29   : > { %569 = vmatpush.bf16.msra.mxu0 %v1336_v0  ;;  %1338 = vmatpush.bf16.msra.mxu1 %v1336_v0  ;;  %v1334_v2 = vld [vmem:[#allocation5 + $0x28] sm:$0xff]  ;;  %v1333_v3 = vld [vmem:[#allocation5 + $0x20] sm:$0xff]  ;;  %v1332_v4 = vld [vmem:[#allocation5 + $0x18] sm:$0xff]  ;;  %s1771_s27 = scalar_lea.vmem [#allocation7], %s1130_s22  ;;  %s1007_s15 = scalar_lea.hbm %s1940_s3, %s1337_s30 }
  0x2a   : > { %1339 = vmatpush.bf16.msra.mxu2 %v1336_v0  ;;  %1340 = vmatpush.bf16.msra.mxu3 %v1336_v0  ;;  %v1331_v5 = vld [vmem:[#allocation5 + $0x10] sm:$0xff]  ;;  %v1330_v6 = vld [vmem:[#allocation5 + $0x8] sm:$0xff]  ;;  %v1329_v7 = vld [vmem:[#allocation5] sm:$0xff]  ;;  %s1008_s10 = sshll.u32 %s1771_s27, 4  ;;  %s1010_s24 = sshll.u32 %s1007_s15, 4  ;;  %s1009_s10 = int_to_ptr.vmem [resolvable:$true] %s1008_s10  ;;  %s1011_s24 = int_to_ptr.hbm [resolvable:$true] %s1010_s24 }
  0x2b   : > { %v1297_v8 = vld [vmem:[%s1721_s19] sm:$0xff]  ;;  %v1298_v12 = vld [vmem:[%s1721_s19 + $0x8] sm:$0xff]  ;;  %v1299_v16 = vld [vmem:[%s1721_s19 + $0x10] sm:$0xff]  ;;  %s995_s25 = scalar_lea.sflag [#allocation4], %s1717_s6  ;;  %s1514_s26 = sshra.s32 %s1011_s24, 4  ;;  %s1515_s26 = int_to_ptr.hbm [resolvable:$true] %s1514_s26 }
  0x2c   : > { %v1305_v9 = vld [vmem:[%s1721_s19 + $0x40] sm:$0xff]  ;;  %v1306_v13 = vld [vmem:[%s1721_s19 + $0x48] sm:$0xff]  ;;  %v1307_v17 = vld [vmem:[%s1721_s19 + $0x50] sm:$0xff]  ;;  %s1516_s28 = scalar_lea.hbm %s1515_s26, 512  ;;  %s1520_s9 = scalar_lea.hbm %s1940_s3, 2048 }
  0x2d   : > { %570 = vmatpush.bf16.msra.mxu0 %v1335_v1  ;;  %1341 = vmatpush.bf16.msra.mxu1 %v1335_v1  ;;  %v1313_v10 = vld [vmem:[%s1721_s19 + $0x80] sm:$0xff]  ;;  %v1314_v14 = vld [vmem:[%s1721_s19 + $0x88] sm:$0xff]  ;;  %v1315_v18 = vld [vmem:[%s1721_s19 + $0x90] sm:$0xff]  ;;  %p1517_p1 = scmp.ne.s32.totalorder %s1515_s26, %s1516_s28  ;;  %p1521_p9 = scmp.lt.s32.totalorder %s1515_s26, %s1940_s3 }
  0x2e   : > { %1342 = vmatpush.bf16.msra.mxu2 %v1335_v1  ;;  %1343 = vmatpush.bf16.msra.mxu3 %v1335_v1  ;;  %v1321_v11 = vld [vmem:[%s1721_s19 + $0xc0] sm:$0xff]  ;;  %v1322_v15 = vld [vmem:[%s1721_s19 + $0xc8] sm:$0xff]  ;;  %v1323_v19 = vld [vmem:[%s1721_s19 + $0xd0] sm:$0xff]  ;;  %p1522_p10 = scmp.lt.s32.totalorder %s1520_s9, %s1516_s28 }
  0x2f   : > { %v1300_v20 = vld [vmem:[%s1721_s19 + $0x18] sm:$0xff]  ;;  %v1301_v24 = vld [vmem:[%s1721_s19 + $0x20] sm:$0xff]  ;;  %v1302_v28 = vld [vmem:[%s1721_s19 + $0x28] sm:$0xff]  ;;  %p1518_p4 = pnand %p1517_p1, %p1694_p3 }
  0x30   : > { %v1308_v21 = vld [vmem:[%s1721_s19 + $0x58] sm:$0xff]  ;;  %v1309_v25 = vld [vmem:[%s1721_s19 + $0x60] sm:$0xff]  ;;  %v1310_v29 = vld [vmem:[%s1721_s19 + $0x68] sm:$0xff]  ;;  %p1523_p11 = por %p1522_p10, %p1521_p9 }
  0x31   : > { %571 = vmatpush.bf16.msra.mxu0 %v1334_v2  ;;  %1344 = vmatpush.bf16.msra.mxu1 %v1334_v2  ;;  %v1316_v22 = vld [vmem:[%s1721_s19 + $0x98] sm:$0xff]  ;;  %v1317_v26 = vld [vmem:[%s1721_s19 + $0xa0] sm:$0xff]  ;;  %v1318_v30 = vld [vmem:[%s1721_s19 + $0xa8] sm:$0xff]  ;;  %p1519_p8 = pneg %p1518_p4 }
  0x32   : > { %1345 = vmatpush.bf16.msra.mxu2 %v1334_v2  ;;  %1346 = vmatpush.bf16.msra.mxu3 %v1334_v2  ;;  %v1324_v23 = vld [vmem:[%s1721_s19 + $0xd8] sm:$0xff]  ;;  %v1325_v27 = vld [vmem:[%s1721_s19 + $0xe0] sm:$0xff]  ;;  %v1326_v31 = vld [vmem:[%s1721_s19 + $0xe8] sm:$0xff] }
  0x33   : > { %v1303_v32 = vld [vmem:[%s1721_s19 + $0x30] sm:$0xff]  ;;  %v1304_v36 = vld [vmem:[%s1721_s19 + $0x38] sm:$0xff]  ;;  %v1766_v40 = vld [vmem:[%s1939_s2] ss:$0 sm:$0xff]  ;;  %p1524_p12 = pnand %p1523_p11, %p1519_p8 }
  0x34   : > { %v1311_v33 = vld [vmem:[%s1721_s19 + $0x70] sm:$0xff]  ;;  %v1312_v37 = vld [vmem:[%s1721_s19 + $0x78] sm:$0xff] }
  0x35   : > { %572 = vmatpush.bf16.msra.mxu0 %v1333_v3  ;;  %1347 = vmatpush.bf16.msra.mxu1 %v1333_v3  ;;  %v1319_v34 = vld [vmem:[%s1721_s19 + $0xb0] sm:$0xff]  ;;  %v1320_v38 = vld [vmem:[%s1721_s19 + $0xb8] sm:$0xff] }
  0x36   : > { %1348 = vmatpush.bf16.msra.mxu2 %v1333_v3  ;;  %1349 = vmatpush.bf16.msra.mxu3 %v1333_v3  ;;  %v1327_v35 = vld [vmem:[%s1721_s19 + $0xf0] sm:$0xff]  ;;  %v1328_v39 = vld [vmem:[%s1721_s19 + $0xf8] sm:$0xff] }
  0x39   : > { %573 = vmatpush.bf16.msra.mxu0 %v1332_v4  ;;  %1350 = vmatpush.bf16.msra.mxu1 %v1332_v4 }
  0x3a   : > { %1351 = vmatpush.bf16.msra.mxu2 %v1332_v4  ;;  %1352 = vmatpush.bf16.msra.mxu3 %v1332_v4 }
  0x3d   : > { %574 = vmatpush.bf16.msra.mxu0 %v1331_v5  ;;  %1353 = vmatpush.bf16.msra.mxu1 %v1331_v5 }
  0x3e   : > { %1354 = vmatpush.bf16.msra.mxu2 %v1331_v5  ;;  %1355 = vmatpush.bf16.msra.mxu3 %v1331_v5 }
  0x41   : > { %575 = vmatpush.bf16.msra.mxu0 %v1330_v6  ;;  %1356 = vmatpush.bf16.msra.mxu1 %v1330_v6 }
  0x42   : > { %1357 = vmatpush.bf16.msra.mxu2 %v1330_v6  ;;  %1358 = vmatpush.bf16.msra.mxu3 %v1330_v6 }
  0x45   : > { %576 = vmatpush.bf16.msra.mxu0 %v1329_v7  ;;  %1359 = vmatpush.bf16.msra.mxu1 %v1329_v7 }
  0x46   : > { %1360 = vmatpush.bf16.msra.mxu2 %v1329_v7  ;;  %1361 = vmatpush.bf16.msra.mxu3 %v1329_v7 }
  0x48   : > { %577 = vmatmul.bf16.vlgmr.msra.gmra.mxu0 %v1297_v8  ;;  %617 = vmatmul.bf16.vlgmr.msra.gmra.mxu1 %v1305_v9 }
  0x49   : > { %657 = vmatmul.bf16.vlgmr.msra.gmra.mxu2 %v1313_v10  ;;  %697 = vmatmul.bf16.vlgmr.msra.gmra.mxu3 %v1321_v11 }
  0x58   : > { %582 = vmatmul.bf16.gmra.mxu0 %v1298_v12  ;;  %622 = vmatmul.bf16.gmra.mxu1 %v1306_v13 }
  0x59   : > { %662 = vmatmul.bf16.gmra.mxu2 %v1314_v14  ;;  %702 = vmatmul.bf16.gmra.mxu3 %v1322_v15 }
  0x68   : > { %587 = vmatmul.bf16.gmra.mxu0 %v1299_v16  ;;  %627 = vmatmul.bf16.gmra.mxu1 %v1307_v17 }
  0x69   : > { %667 = vmatmul.bf16.gmra.mxu2 %v1315_v18  ;;  %707 = vmatmul.bf16.gmra.mxu3 %v1323_v19 }
  0x78   : > { %592 = vmatmul.bf16.gmra.mxu0 %v1300_v20  ;;  %632 = vmatmul.bf16.gmra.mxu1 %v1308_v21 }
  0x79   : > { %672 = vmatmul.bf16.gmra.mxu2 %v1316_v22  ;;  %712 = vmatmul.bf16.gmra.mxu3 %v1324_v23 }
  0x88   : > { %597 = vmatmul.bf16.gmra.mxu0 %v1301_v24  ;;  %637 = vmatmul.bf16.gmra.mxu1 %v1309_v25 }
  0x89   : > { %677 = vmatmul.bf16.gmra.mxu2 %v1317_v26  ;;  %717 = vmatmul.bf16.gmra.mxu3 %v1325_v27 }
  0x98   : > { %602 = vmatmul.bf16.gmra.mxu0 %v1302_v28  ;;  %642 = vmatmul.bf16.gmra.mxu1 %v1310_v29 }
  0x99   : > { %682 = vmatmul.bf16.gmra.mxu2 %v1318_v30  ;;  %722 = vmatmul.bf16.gmra.mxu3 %v1326_v31 }
  0xa8   : > { %607 = vmatmul.bf16.gmra.mxu0 %v1303_v32  ;;  %647 = vmatmul.bf16.gmra.mxu1 %v1311_v33 }
  0xa9   : > { %687 = vmatmul.bf16.gmra.mxu2 %v1319_v34  ;;  %727 = vmatmul.bf16.gmra.mxu3 %v1327_v35 }
  0xb8   : > { %612 = vmatmul.bf16.gmra.mxu0 %v1304_v36  ;;  %652 = vmatmul.bf16.gmra.mxu1 %v1312_v37 }
  0xb9   : > { %692 = vmatmul.bf16.gmra.mxu2 %v1320_v38  ;;  %732 = vmatmul.bf16.gmra.mxu3 %v1328_v39 }
  0xc5   : > { %v578_v41 = vpop.f32.mrf.mxu0  ;;  %v618_v42 = vpop.f32.mrf.mxu1 }
  0xc6   : > { %v579_v43 = vadd.f32 %v1766_v40, %v578_v41  ;;  %v619_v44 = vadd.f32 %v1766_v40, %v618_v42 }
  0xc8   : > { %vm738_vm0 = vcmp.ge.f32.partialorder %v579_v43, 0.0  ;;  %v802_v45 = vmul.f32 0.2, %v579_v43  ;;  %vm754_vm1 = vcmp.ge.f32.partialorder %v619_v44, 0.0  ;;  %v818_v46 = vmul.f32 0.2, %v619_v44 }
  0xca   : > { %v866_v47 = vsel %vm738_vm0, %v579_v43, %v802_v45  ;;  %v882_v48 = vsel %vm754_vm1, %v619_v44, %v818_v46 }
  0xcb   : > { %930 = vst [vmem:[%s1771_s27] sm:$0xff] %v866_v47 }
  0xcc   : > { %946 = vst [vmem:[%s1771_s27 + $0x80] sm:$0xff] %v882_v48  ;;  %v658_v49 = vpop.f32.mrf.mxu2  ;;  %v698_v50 = vpop.f32.mrf.mxu3 }
  0xcd   : > { %v659_v51 = vadd.f32 %v1766_v40, %v658_v49  ;;  %v699_v52 = vadd.f32 %v1766_v40, %v698_v50  ;;  %v580_v53 = vpop.f32.mrf.mxu0  ;;  %v620_v54 = vpop.f32.mrf.mxu1 }
  0xce   : > { %v581_v55 = vadd.f32 %v1766_v40, %v580_v53  ;;  %v621_v56 = vadd.f32 %v1766_v40, %v620_v54 }
  0xcf   : > { %vm770_vm2 = vcmp.ge.f32.partialorder %v659_v51, 0.0  ;;  %v834_v57 = vmul.f32 0.2, %v659_v51  ;;  %vm786_vm3 = vcmp.ge.f32.partialorder %v699_v52, 0.0  ;;  %v850_v58 = vmul.f32 0.2, %v699_v52 }
  0xd0   : > { %vm739_vm4 = vcmp.ge.f32.partialorder %v581_v55, 0.0  ;;  %v803_v59 = vmul.f32 0.2, %v581_v55  ;;  %vm755_vm5 = vcmp.ge.f32.partialorder %v621_v56, 0.0  ;;  %v819_v60 = vmul.f32 0.2, %v621_v56 }
  0xd1   : > { %v898_v61 = vsel %vm770_vm2, %v659_v51, %v834_v57  ;;  %v914_v62 = vsel %vm786_vm3, %v699_v52, %v850_v58 }
  0xd2   : > { %962 = vst [vmem:[%s1771_s27 + $0x100] sm:$0xff] %v898_v61  ;;  %v867_v63 = vsel %vm739_vm4, %v581_v55, %v803_v59  ;;  %v883_v0 = vsel %vm755_vm5, %v621_v56, %v819_v60 }
  0xd3   : > { %978 = vst [vmem:[%s1771_s27 + $0x180] sm:$0xff] %v914_v62 }
  0xd4   : > { %931 = vst [vmem:[%s1771_s27 + $0x8] sm:$0xff] %v867_v63  ;;  %v660_v1 = vpop.f32.mrf.mxu2  ;;  %v700_v2 = vpop.f32.mrf.mxu3 }
  0xd5   : > { %947 = vst [vmem:[%s1771_s27 + $0x88] sm:$0xff] %v883_v0  ;;  %v661_v3 = vadd.f32 %v1766_v40, %v660_v1  ;;  %v701_v4 = vadd.f32 %v1766_v40, %v700_v2  ;;  %v583_v5 = vpop.f32.mrf.mxu0  ;;  %v623_v6 = vpop.f32.mrf.mxu1 }
  0xd6   : > { %v584_v7 = vadd.f32 %v1766_v40, %v583_v5  ;;  %v624_v8 = vadd.f32 %v1766_v40, %v623_v6 }
  0xd7   : > { %vm771_vm6 = vcmp.ge.f32.partialorder %v661_v3, 0.0  ;;  %v835_v9 = vmul.f32 0.2, %v661_v3  ;;  %vm787_vm7 = vcmp.ge.f32.partialorder %v701_v4, 0.0  ;;  %v851_v10 = vmul.f32 0.2, %v701_v4 }
  0xd8   : > { %vm740_vm8 = vcmp.ge.f32.partialorder %v584_v7, 0.0  ;;  %v804_v11 = vmul.f32 0.2, %v584_v7  ;;  %vm756_vm9 = vcmp.ge.f32.partialorder %v624_v8, 0.0  ;;  %v820_v12 = vmul.f32 0.2, %v624_v8 }
  0xd9   : > { %v899_v13 = vsel %vm771_vm6, %v661_v3, %v835_v9  ;;  %v915_v14 = vsel %vm787_vm7, %v701_v4, %v851_v10 }
  0xda   : > { %963 = vst [vmem:[%s1771_s27 + $0x108] sm:$0xff] %v899_v13  ;;  %v868_v15 = vsel %vm740_vm8, %v584_v7, %v804_v11  ;;  %v884_v16 = vsel %vm756_vm9, %v624_v8, %v820_v12 }
  0xdb   : > { %979 = vst [vmem:[%s1771_s27 + $0x188] sm:$0xff] %v915_v14 }
  0xdc   : > { %932 = vst [vmem:[%s1771_s27 + $0x10] sm:$0xff] %v868_v15  ;;  %v663_v17 = vpop.f32.mrf.mxu2  ;;  %v703_v18 = vpop.f32.mrf.mxu3 }
  0xdd   : > { %948 = vst [vmem:[%s1771_s27 + $0x90] sm:$0xff] %v884_v16  ;;  %v664_v19 = vadd.f32 %v1766_v40, %v663_v17  ;;  %v704_v20 = vadd.f32 %v1766_v40, %v703_v18  ;;  %v585_v21 = vpop.f32.mrf.mxu0  ;;  %v625_v22 = vpop.f32.mrf.mxu1 }
  0xde   : > { %v586_v23 = vadd.f32 %v1766_v40, %v585_v21  ;;  %v626_v24 = vadd.f32 %v1766_v40, %v625_v22 }
  0xdf   : > { %vm772_vm10 = vcmp.ge.f32.partialorder %v664_v19, 0.0  ;;  %v836_v25 = vmul.f32 0.2, %v664_v19  ;;  %vm788_vm11 = vcmp.ge.f32.partialorder %v704_v20, 0.0  ;;  %v852_v26 = vmul.f32 0.2, %v704_v20 }
  0xe0   : > { %vm741_vm12 = vcmp.ge.f32.partialorder %v586_v23, 0.0  ;;  %v805_v27 = vmul.f32 0.2, %v586_v23  ;;  %vm757_vm13 = vcmp.ge.f32.partialorder %v626_v24, 0.0  ;;  %v821_v28 = vmul.f32 0.2, %v626_v24 }
  0xe1   : > { %v900_v29 = vsel %vm772_vm10, %v664_v19, %v836_v25  ;;  %v916_v30 = vsel %vm788_vm11, %v704_v20, %v852_v26 }
  0xe2   : > { %964 = vst [vmem:[%s1771_s27 + $0x110] sm:$0xff] %v900_v29  ;;  %v869_v31 = vsel %vm741_vm12, %v586_v23, %v805_v27  ;;  %v885_v32 = vsel %vm757_vm13, %v626_v24, %v821_v28 }
  0xe3   : > { %980 = vst [vmem:[%s1771_s27 + $0x190] sm:$0xff] %v916_v30 }
  0xe4   : > { %933 = vst [vmem:[%s1771_s27 + $0x18] sm:$0xff] %v869_v31  ;;  %v665_v33 = vpop.f32.mrf.mxu2  ;;  %v705_v34 = vpop.f32.mrf.mxu3 }
  0xe5   : > { %949 = vst [vmem:[%s1771_s27 + $0x98] sm:$0xff] %v885_v32  ;;  %v666_v35 = vadd.f32 %v1766_v40, %v665_v33  ;;  %v706_v36 = vadd.f32 %v1766_v40, %v705_v34  ;;  %v588_v37 = vpop.f32.mrf.mxu0  ;;  %v628_v38 = vpop.f32.mrf.mxu1 }
  0xe6   : > { %v589_v39 = vadd.f32 %v1766_v40, %v588_v37  ;;  %v629_v41 = vadd.f32 %v1766_v40, %v628_v38 }
  0xe7   : > { %vm773_vm14 = vcmp.ge.f32.partialorder %v666_v35, 0.0  ;;  %v837_v42 = vmul.f32 0.2, %v666_v35  ;;  %vm789_vm15 = vcmp.ge.f32.partialorder %v706_v36, 0.0  ;;  %v853_v43 = vmul.f32 0.2, %v706_v36 }
  0xe8   : > { %vm742_vm0 = vcmp.ge.f32.partialorder %v589_v39, 0.0  ;;  %v806_v44 = vmul.f32 0.2, %v589_v39  ;;  %vm758_vm1 = vcmp.ge.f32.partialorder %v629_v41, 0.0  ;;  %v822_v45 = vmul.f32 0.2, %v629_v41 }
  0xe9   : > { %v901_v46 = vsel %vm773_vm14, %v666_v35, %v837_v42  ;;  %v917_v47 = vsel %vm789_vm15, %v706_v36, %v853_v43 }
  0xea   : > { %965 = vst [vmem:[%s1771_s27 + $0x118] sm:$0xff] %v901_v46  ;;  %v870_v48 = vsel %vm742_vm0, %v589_v39, %v806_v44  ;;  %v886_v49 = vsel %vm758_vm1, %v629_v41, %v822_v45 }
  0xeb   : > { %981 = vst [vmem:[%s1771_s27 + $0x198] sm:$0xff] %v917_v47 }
  0xec   : > { %934 = vst [vmem:[%s1771_s27 + $0x20] sm:$0xff] %v870_v48  ;;  %v668_v50 = vpop.f32.mrf.mxu2  ;;  %v708_v51 = vpop.f32.mrf.mxu3 }
  0xed   : > { %950 = vst [vmem:[%s1771_s27 + $0xa0] sm:$0xff] %v886_v49  ;;  %v669_v52 = vadd.f32 %v1766_v40, %v668_v50  ;;  %v709_v53 = vadd.f32 %v1766_v40, %v708_v51  ;;  %v590_v54 = vpop.f32.mrf.mxu0  ;;  %v630_v55 = vpop.f32.mrf.mxu1 }
  0xee   : > { %v591_v56 = vadd.f32 %v1766_v40, %v590_v54  ;;  %v631_v57 = vadd.f32 %v1766_v40, %v630_v55 }
  0xef   : > { %vm774_vm2 = vcmp.ge.f32.partialorder %v669_v52, 0.0  ;;  %v838_v58 = vmul.f32 0.2, %v669_v52  ;;  %vm790_vm3 = vcmp.ge.f32.partialorder %v709_v53, 0.0  ;;  %v854_v59 = vmul.f32 0.2, %v709_v53 }
  0xf0   : > { %vm743_vm4 = vcmp.ge.f32.partialorder %v591_v56, 0.0  ;;  %v807_v60 = vmul.f32 0.2, %v591_v56  ;;  %vm759_vm5 = vcmp.ge.f32.partialorder %v631_v57, 0.0  ;;  %v823_v61 = vmul.f32 0.2, %v631_v57 }
  0xf1   : > { %v902_v62 = vsel %vm774_vm2, %v669_v52, %v838_v58  ;;  %v918_v63 = vsel %vm790_vm3, %v709_v53, %v854_v59 }
  0xf2   : > { %966 = vst [vmem:[%s1771_s27 + $0x120] sm:$0xff] %v902_v62  ;;  %v871_v0 = vsel %vm743_vm4, %v591_v56, %v807_v60  ;;  %v887_v1 = vsel %vm759_vm5, %v631_v57, %v823_v61 }
  0xf3   : > { %982 = vst [vmem:[%s1771_s27 + $0x1a0] sm:$0xff] %v918_v63 }
  0xf4   : > { %935 = vst [vmem:[%s1771_s27 + $0x28] sm:$0xff] %v871_v0  ;;  %v670_v2 = vpop.f32.mrf.mxu2  ;;  %v710_v3 = vpop.f32.mrf.mxu3 }
  0xf5   : > { %951 = vst [vmem:[%s1771_s27 + $0xa8] sm:$0xff] %v887_v1  ;;  %v671_v4 = vadd.f32 %v1766_v40, %v670_v2  ;;  %v711_v5 = vadd.f32 %v1766_v40, %v710_v3  ;;  %v593_v6 = vpop.f32.mrf.mxu0  ;;  %v633_v7 = vpop.f32.mrf.mxu1 }
  0xf6   : > { %v594_v8 = vadd.f32 %v1766_v40, %v593_v6  ;;  %v634_v9 = vadd.f32 %v1766_v40, %v633_v7 }
  0xf7   : > { %vm775_vm6 = vcmp.ge.f32.partialorder %v671_v4, 0.0  ;;  %v839_v10 = vmul.f32 0.2, %v671_v4  ;;  %vm791_vm7 = vcmp.ge.f32.partialorder %v711_v5, 0.0  ;;  %v855_v11 = vmul.f32 0.2, %v711_v5 }
  0xf8   : > { %vm744_vm8 = vcmp.ge.f32.partialorder %v594_v8, 0.0  ;;  %v808_v12 = vmul.f32 0.2, %v594_v8  ;;  %vm760_vm9 = vcmp.ge.f32.partialorder %v634_v9, 0.0  ;;  %v824_v13 = vmul.f32 0.2, %v634_v9 }
  0xf9   : > { %v903_v14 = vsel %vm775_vm6, %v671_v4, %v839_v10  ;;  %v919_v15 = vsel %vm791_vm7, %v711_v5, %v855_v11 }
  0xfa   : > { %967 = vst [vmem:[%s1771_s27 + $0x128] sm:$0xff] %v903_v14  ;;  %v872_v16 = vsel %vm744_vm8, %v594_v8, %v808_v12  ;;  %v888_v17 = vsel %vm760_vm9, %v634_v9, %v824_v13 }
  0xfb   : > { %983 = vst [vmem:[%s1771_s27 + $0x1a8] sm:$0xff] %v919_v15 }
  0xfc   : > { %936 = vst [vmem:[%s1771_s27 + $0x30] sm:$0xff] %v872_v16  ;;  %v673_v18 = vpop.f32.mrf.mxu2  ;;  %v713_v19 = vpop.f32.mrf.mxu3 }
  0xfd   : > { %952 = vst [vmem:[%s1771_s27 + $0xb0] sm:$0xff] %v888_v17  ;;  %v674_v20 = vadd.f32 %v1766_v40, %v673_v18  ;;  %v714_v21 = vadd.f32 %v1766_v40, %v713_v19  ;;  %v595_v22 = vpop.f32.mrf.mxu0  ;;  %v635_v23 = vpop.f32.mrf.mxu1 }
  0xfe   : > { %v596_v24 = vadd.f32 %v1766_v40, %v595_v22  ;;  %v636_v25 = vadd.f32 %v1766_v40, %v635_v23 }
  0xff   : > { %vm776_vm10 = vcmp.ge.f32.partialorder %v674_v20, 0.0  ;;  %v840_v26 = vmul.f32 0.2, %v674_v20  ;;  %vm792_vm11 = vcmp.ge.f32.partialorder %v714_v21, 0.0  ;;  %v856_v27 = vmul.f32 0.2, %v714_v21 }
 0x100   : > { %vm745_vm12 = vcmp.ge.f32.partialorder %v596_v24, 0.0  ;;  %v809_v28 = vmul.f32 0.2, %v596_v24  ;;  %vm761_vm13 = vcmp.ge.f32.partialorder %v636_v25, 0.0  ;;  %v825_v29 = vmul.f32 0.2, %v636_v25 }
 0x101   : > { %v904_v30 = vsel %vm776_vm10, %v674_v20, %v840_v26  ;;  %v920_v31 = vsel %vm792_vm11, %v714_v21, %v856_v27 }
 0x102   : > { %968 = vst [vmem:[%s1771_s27 + $0x130] sm:$0xff] %v904_v30  ;;  %v873_v32 = vsel %vm745_vm12, %v596_v24, %v809_v28  ;;  %v889_v33 = vsel %vm761_vm13, %v636_v25, %v825_v29 }
 0x103   : > { %984 = vst [vmem:[%s1771_s27 + $0x1b0] sm:$0xff] %v920_v31 }
 0x104   : > { %937 = vst [vmem:[%s1771_s27 + $0x38] sm:$0xff] %v873_v32  ;;  %v675_v34 = vpop.f32.mrf.mxu2  ;;  %v715_v35 = vpop.f32.mrf.mxu3 }
 0x105   : > { %953 = vst [vmem:[%s1771_s27 + $0xb8] sm:$0xff] %v889_v33  ;;  %v676_v36 = vadd.f32 %v1766_v40, %v675_v34  ;;  %v716_v37 = vadd.f32 %v1766_v40, %v715_v35  ;;  %v598_v38 = vpop.f32.mrf.mxu0  ;;  %v638_v39 = vpop.f32.mrf.mxu1 }
 0x106   : > { %v599_v41 = vadd.f32 %v1766_v40, %v598_v38  ;;  %v639_v42 = vadd.f32 %v1766_v40, %v638_v39 }
 0x107   : > { %vm777_vm14 = vcmp.ge.f32.partialorder %v676_v36, 0.0  ;;  %v841_v43 = vmul.f32 0.2, %v676_v36  ;;  %vm793_vm15 = vcmp.ge.f32.partialorder %v716_v37, 0.0  ;;  %v857_v44 = vmul.f32 0.2, %v716_v37 }
 0x108   : > { %vm746_vm0 = vcmp.ge.f32.partialorder %v599_v41, 0.0  ;;  %v810_v45 = vmul.f32 0.2, %v599_v41  ;;  %vm762_vm1 = vcmp.ge.f32.partialorder %v639_v42, 0.0  ;;  %v826_v46 = vmul.f32 0.2, %v639_v42 }
 0x109   : > { %v905_v47 = vsel %vm777_vm14, %v676_v36, %v841_v43  ;;  %v921_v48 = vsel %vm793_vm15, %v716_v37, %v857_v44 }
 0x10a   : > { %969 = vst [vmem:[%s1771_s27 + $0x138] sm:$0xff] %v905_v47  ;;  %v874_v49 = vsel %vm746_vm0, %v599_v41, %v810_v45  ;;  %v890_v50 = vsel %vm762_vm1, %v639_v42, %v826_v46 }
 0x10b   : > { %985 = vst [vmem:[%s1771_s27 + $0x1b8] sm:$0xff] %v921_v48 }
 0x10c   : > { %938 = vst [vmem:[%s1771_s27 + $0x40] sm:$0xff] %v874_v49  ;;  %v678_v51 = vpop.f32.mrf.mxu2  ;;  %v718_v52 = vpop.f32.mrf.mxu3 }
 0x10d   : > { %954 = vst [vmem:[%s1771_s27 + $0xc0] sm:$0xff] %v890_v50  ;;  %v679_v53 = vadd.f32 %v1766_v40, %v678_v51  ;;  %v719_v54 = vadd.f32 %v1766_v40, %v718_v52  ;;  %v600_v55 = vpop.f32.mrf.mxu0  ;;  %v640_v56 = vpop.f32.mrf.mxu1 }
 0x10e   : > { %v601_v57 = vadd.f32 %v1766_v40, %v600_v55  ;;  %v641_v58 = vadd.f32 %v1766_v40, %v640_v56 }
 0x10f   : > { %vm778_vm2 = vcmp.ge.f32.partialorder %v679_v53, 0.0  ;;  %v842_v59 = vmul.f32 0.2, %v679_v53  ;;  %vm794_vm3 = vcmp.ge.f32.partialorder %v719_v54, 0.0  ;;  %v858_v60 = vmul.f32 0.2, %v719_v54 }
 0x110   : > { %vm747_vm4 = vcmp.ge.f32.partialorder %v601_v57, 0.0  ;;  %v811_v61 = vmul.f32 0.2, %v601_v57  ;;  %vm763_vm5 = vcmp.ge.f32.partialorder %v641_v58, 0.0  ;;  %v827_v62 = vmul.f32 0.2, %v641_v58 }
 0x111   : > { %v906_v63 = vsel %vm778_vm2, %v679_v53, %v842_v59  ;;  %v922_v0 = vsel %vm794_vm3, %v719_v54, %v858_v60 }
 0x112   : > { %970 = vst [vmem:[%s1771_s27 + $0x140] sm:$0xff] %v906_v63  ;;  %v875_v1 = vsel %vm747_vm4, %v601_v57, %v811_v61  ;;  %v891_v2 = vsel %vm763_vm5, %v641_v58, %v827_v62 }
 0x113   : > { %986 = vst [vmem:[%s1771_s27 + $0x1c0] sm:$0xff] %v922_v0 }
 0x114   : > { %939 = vst [vmem:[%s1771_s27 + $0x48] sm:$0xff] %v875_v1  ;;  %v680_v3 = vpop.f32.mrf.mxu2  ;;  %v720_v4 = vpop.f32.mrf.mxu3 }
 0x115   : > { %955 = vst [vmem:[%s1771_s27 + $0xc8] sm:$0xff] %v891_v2  ;;  %v681_v5 = vadd.f32 %v1766_v40, %v680_v3  ;;  %v721_v6 = vadd.f32 %v1766_v40, %v720_v4  ;;  %v603_v7 = vpop.f32.mrf.mxu0  ;;  %v643_v8 = vpop.f32.mrf.mxu1 }
 0x116   : > { %v604_v9 = vadd.f32 %v1766_v40, %v603_v7  ;;  %v644_v10 = vadd.f32 %v1766_v40, %v643_v8 }
 0x117   : > { %vm779_vm6 = vcmp.ge.f32.partialorder %v681_v5, 0.0  ;;  %v843_v11 = vmul.f32 0.2, %v681_v5  ;;  %vm795_vm7 = vcmp.ge.f32.partialorder %v721_v6, 0.0  ;;  %v859_v12 = vmul.f32 0.2, %v721_v6 }
 0x118   : > { %vm748_vm8 = vcmp.ge.f32.partialorder %v604_v9, 0.0  ;;  %v812_v13 = vmul.f32 0.2, %v604_v9  ;;  %vm764_vm9 = vcmp.ge.f32.partialorder %v644_v10, 0.0  ;;  %v828_v14 = vmul.f32 0.2, %v644_v10 }
 0x119   : > { %v907_v15 = vsel %vm779_vm6, %v681_v5, %v843_v11  ;;  %v923_v16 = vsel %vm795_vm7, %v721_v6, %v859_v12 }
 0x11a   : > { %971 = vst [vmem:[%s1771_s27 + $0x148] sm:$0xff] %v907_v15  ;;  %v876_v17 = vsel %vm748_vm8, %v604_v9, %v812_v13  ;;  %v892_v18 = vsel %vm764_vm9, %v644_v10, %v828_v14 }
 0x11b   : > { %987 = vst [vmem:[%s1771_s27 + $0x1c8] sm:$0xff] %v923_v16 }
 0x11c   : > { %940 = vst [vmem:[%s1771_s27 + $0x50] sm:$0xff] %v876_v17  ;;  %v683_v19 = vpop.f32.mrf.mxu2  ;;  %v723_v20 = vpop.f32.mrf.mxu3 }
 0x11d   : > { %956 = vst [vmem:[%s1771_s27 + $0xd0] sm:$0xff] %v892_v18  ;;  %v684_v21 = vadd.f32 %v1766_v40, %v683_v19  ;;  %v724_v22 = vadd.f32 %v1766_v40, %v723_v20  ;;  %v605_v23 = vpop.f32.mrf.mxu0  ;;  %v645_v24 = vpop.f32.mrf.mxu1 }
 0x11e   : > { %v606_v25 = vadd.f32 %v1766_v40, %v605_v23  ;;  %v646_v26 = vadd.f32 %v1766_v40, %v645_v24 }
 0x11f   : > { %vm780_vm10 = vcmp.ge.f32.partialorder %v684_v21, 0.0  ;;  %v844_v27 = vmul.f32 0.2, %v684_v21  ;;  %vm796_vm11 = vcmp.ge.f32.partialorder %v724_v22, 0.0  ;;  %v860_v28 = vmul.f32 0.2, %v724_v22 }
 0x120   : > { %vm749_vm12 = vcmp.ge.f32.partialorder %v606_v25, 0.0  ;;  %v813_v29 = vmul.f32 0.2, %v606_v25  ;;  %vm765_vm13 = vcmp.ge.f32.partialorder %v646_v26, 0.0  ;;  %v829_v30 = vmul.f32 0.2, %v646_v26 }
 0x121   : > { %v908_v31 = vsel %vm780_vm10, %v684_v21, %v844_v27  ;;  %v924_v32 = vsel %vm796_vm11, %v724_v22, %v860_v28 }
 0x122   : > { %972 = vst [vmem:[%s1771_s27 + $0x150] sm:$0xff] %v908_v31  ;;  %v877_v33 = vsel %vm749_vm12, %v606_v25, %v813_v29  ;;  %v893_v34 = vsel %vm765_vm13, %v646_v26, %v829_v30 }
 0x123   : > { %988 = vst [vmem:[%s1771_s27 + $0x1d0] sm:$0xff] %v924_v32 }
 0x124   : > { %941 = vst [vmem:[%s1771_s27 + $0x58] sm:$0xff] %v877_v33  ;;  %v685_v35 = vpop.f32.mrf.mxu2  ;;  %v725_v36 = vpop.f32.mrf.mxu3 }
 0x125   : > { %957 = vst [vmem:[%s1771_s27 + $0xd8] sm:$0xff] %v893_v34  ;;  %v686_v37 = vadd.f32 %v1766_v40, %v685_v35  ;;  %v726_v38 = vadd.f32 %v1766_v40, %v725_v36  ;;  %v608_v39 = vpop.f32.mrf.mxu0  ;;  %v648_v41 = vpop.f32.mrf.mxu1 }
 0x126   : > { %v609_v42 = vadd.f32 %v1766_v40, %v608_v39  ;;  %v649_v43 = vadd.f32 %v1766_v40, %v648_v41 }
 0x127   : > { %vm781_vm14 = vcmp.ge.f32.partialorder %v686_v37, 0.0  ;;  %v845_v44 = vmul.f32 0.2, %v686_v37  ;;  %vm797_vm15 = vcmp.ge.f32.partialorder %v726_v38, 0.0  ;;  %v861_v45 = vmul.f32 0.2, %v726_v38 }
 0x128   : > { %vm750_vm0 = vcmp.ge.f32.partialorder %v609_v42, 0.0  ;;  %v814_v46 = vmul.f32 0.2, %v609_v42  ;;  %vm766_vm1 = vcmp.ge.f32.partialorder %v649_v43, 0.0  ;;  %v830_v47 = vmul.f32 0.2, %v649_v43 }
 0x129   : > { %v909_v48 = vsel %vm781_vm14, %v686_v37, %v845_v44  ;;  %v925_v49 = vsel %vm797_vm15, %v726_v38, %v861_v45 }
 0x12a   : > { %973 = vst [vmem:[%s1771_s27 + $0x158] sm:$0xff] %v909_v48  ;;  %v878_v50 = vsel %vm750_vm0, %v609_v42, %v814_v46  ;;  %v894_v51 = vsel %vm766_vm1, %v649_v43, %v830_v47 }
 0x12b   : > { %989 = vst [vmem:[%s1771_s27 + $0x1d8] sm:$0xff] %v925_v49 }
 0x12c   : > { %942 = vst [vmem:[%s1771_s27 + $0x60] sm:$0xff] %v878_v50  ;;  %v688_v52 = vpop.f32.mrf.mxu2  ;;  %v728_v53 = vpop.f32.mrf.mxu3 }
 0x12d   : > { %958 = vst [vmem:[%s1771_s27 + $0xe0] sm:$0xff] %v894_v51  ;;  %v689_v54 = vadd.f32 %v1766_v40, %v688_v52  ;;  %v729_v55 = vadd.f32 %v1766_v40, %v728_v53  ;;  %v610_v56 = vpop.f32.mrf.mxu0  ;;  %v650_v57 = vpop.f32.mrf.mxu1 }
 0x12e   : > { %v611_v58 = vadd.f32 %v1766_v40, %v610_v56  ;;  %v651_v59 = vadd.f32 %v1766_v40, %v650_v57 }
 0x12f   : > { %vm782_vm2 = vcmp.ge.f32.partialorder %v689_v54, 0.0  ;;  %v846_v60 = vmul.f32 0.2, %v689_v54  ;;  %vm798_vm3 = vcmp.ge.f32.partialorder %v729_v55, 0.0  ;;  %v862_v61 = vmul.f32 0.2, %v729_v55 }
 0x130   : > { %vm751_vm4 = vcmp.ge.f32.partialorder %v611_v58, 0.0  ;;  %v815_v62 = vmul.f32 0.2, %v611_v58  ;;  %vm767_vm5 = vcmp.ge.f32.partialorder %v651_v59, 0.0  ;;  %v831_v63 = vmul.f32 0.2, %v651_v59 }
 0x131   : > { %v910_v0 = vsel %vm782_vm2, %v689_v54, %v846_v60  ;;  %v926_v1 = vsel %vm798_vm3, %v729_v55, %v862_v61 }
 0x132   : > { %974 = vst [vmem:[%s1771_s27 + $0x160] sm:$0xff] %v910_v0  ;;  %v879_v2 = vsel %vm751_vm4, %v611_v58, %v815_v62  ;;  %v895_v3 = vsel %vm767_vm5, %v651_v59, %v831_v63 }
 0x133   : > { %990 = vst [vmem:[%s1771_s27 + $0x1e0] sm:$0xff] %v926_v1 }
 0x134   : > { %943 = vst [vmem:[%s1771_s27 + $0x68] sm:$0xff] %v879_v2  ;;  %v690_v4 = vpop.f32.mrf.mxu2  ;;  %v730_v5 = vpop.f32.mrf.mxu3 }
 0x135   : > { %959 = vst [vmem:[%s1771_s27 + $0xe8] sm:$0xff] %v895_v3  ;;  %v691_v6 = vadd.f32 %v1766_v40, %v690_v4  ;;  %v731_v7 = vadd.f32 %v1766_v40, %v730_v5  ;;  %v613_v8 = vpop.f32.mrf.mxu0  ;;  %v653_v9 = vpop.f32.mrf.mxu1 }
 0x136   : > { %v614_v10 = vadd.f32 %v1766_v40, %v613_v8  ;;  %v654_v11 = vadd.f32 %v1766_v40, %v653_v9 }
 0x137   : > { %vm783_vm6 = vcmp.ge.f32.partialorder %v691_v6, 0.0  ;;  %v847_v12 = vmul.f32 0.2, %v691_v6  ;;  %vm799_vm7 = vcmp.ge.f32.partialorder %v731_v7, 0.0  ;;  %v863_v13 = vmul.f32 0.2, %v731_v7 }
 0x138   : > { %vm752_vm8 = vcmp.ge.f32.partialorder %v614_v10, 0.0  ;;  %v816_v14 = vmul.f32 0.2, %v614_v10  ;;  %vm768_vm9 = vcmp.ge.f32.partialorder %v654_v11, 0.0  ;;  %v832_v15 = vmul.f32 0.2, %v654_v11 }
 0x139   : > { %v911_v16 = vsel %vm783_vm6, %v691_v6, %v847_v12  ;;  %v927_v17 = vsel %vm799_vm7, %v731_v7, %v863_v13 }
 0x13a   : > { %975 = vst [vmem:[%s1771_s27 + $0x168] sm:$0xff] %v911_v16  ;;  %v880_v18 = vsel %vm752_vm8, %v614_v10, %v816_v14  ;;  %v896_v19 = vsel %vm768_vm9, %v654_v11, %v832_v15 }
 0x13b   : > { %991 = vst [vmem:[%s1771_s27 + $0x1e8] sm:$0xff] %v927_v17 }
 0x13c   : > { %944 = vst [vmem:[%s1771_s27 + $0x70] sm:$0xff] %v880_v18  ;;  %v693_v20 = vpop.f32.mrf.mxu2  ;;  %v733_v21 = vpop.f32.mrf.mxu3 }
 0x13d   : > { %960 = vst [vmem:[%s1771_s27 + $0xf0] sm:$0xff] %v896_v19  ;;  %v694_v22 = vadd.f32 %v1766_v40, %v693_v20  ;;  %v734_v23 = vadd.f32 %v1766_v40, %v733_v21  ;;  %v615_v24 = vpop.f32.mrf.mxu0  ;;  %v655_v25 = vpop.f32.mrf.mxu1 }
 0x13e   : > { %v616_v26 = vadd.f32 %v1766_v40, %v615_v24  ;;  %v656_v27 = vadd.f32 %v1766_v40, %v655_v25 }
 0x13f   : > { %vm784_vm10 = vcmp.ge.f32.partialorder %v694_v22, 0.0  ;;  %v848_v28 = vmul.f32 0.2, %v694_v22  ;;  %vm800_vm11 = vcmp.ge.f32.partialorder %v734_v23, 0.0  ;;  %v864_v29 = vmul.f32 0.2, %v734_v23 }
 0x140   : > { %vm753_vm12 = vcmp.ge.f32.partialorder %v616_v26, 0.0  ;;  %v817_v30 = vmul.f32 0.2, %v616_v26  ;;  %vm769_vm13 = vcmp.ge.f32.partialorder %v656_v27, 0.0  ;;  %v833_v31 = vmul.f32 0.2, %v656_v27 }
 0x141   : > { %v912_v32 = vsel %vm784_vm10, %v694_v22, %v848_v28  ;;  %v928_v33 = vsel %vm800_vm11, %v734_v23, %v864_v29 }
 0x142   : > { %976 = vst [vmem:[%s1771_s27 + $0x170] sm:$0xff] %v912_v32  ;;  %v881_v34 = vsel %vm753_vm12, %v616_v26, %v817_v30  ;;  %v897_v35 = vsel %vm769_vm13, %v656_v27, %v833_v31 }
 0x143   : > { %992 = vst [vmem:[%s1771_s27 + $0x1f0] sm:$0xff] %v928_v33 }
 0x144   : > { %945 = vst [vmem:[%s1771_s27 + $0x78] sm:$0xff] %v881_v34  ;;  %v695_v36 = vpop.f32.mrf.mxu2  ;;  %v735_v37 = vpop.f32.mrf.mxu3 }
 0x145   : > { %961 = vst [vmem:[%s1771_s27 + $0xf8] sm:$0xff] %v897_v35  ;;  %v696_v38 = vadd.f32 %v1766_v40, %v695_v36  ;;  %v736_v39 = vadd.f32 %v1766_v40, %v735_v37 }
 0x147   : > { %vm785_vm14 = vcmp.ge.f32.partialorder %v696_v38, 0.0  ;;  %v849_v41 = vmul.f32 0.2, %v696_v38  ;;  %vm801_vm15 = vcmp.ge.f32.partialorder %v736_v39, 0.0  ;;  %v865_v42 = vmul.f32 0.2, %v736_v39 }
 0x149   : > { %v913_v43 = vsel %vm785_vm14, %v696_v38, %v849_v41  ;;  %v929_v44 = vsel %vm801_vm15, %v736_v39, %v865_v42 }
 0x14a   : > { %977 = vst [vmem:[%s1771_s27 + $0x178] sm:$0xff] %v913_v43 }
 0x14b   : > { %993 = vst [vmem:[%s1771_s27 + $0x1f8] sm:$0xff] %v929_v44 }
 0x14c   : > { %1527 = shalt.err (!%p1524_p12)
}
 0x14d   : > { %s1591_s6 = smov 128   ;;  %s1592_s1 = smov 8  }
 0x14e   : > { %1368 = dma.vmem_to_hbm [thread:$0]  (%p1694_p3), %s1009_s10, 8192, %s1011_s24, %s995_s25, %s1591_s6, %s1591_s6, %s1592_s1  }
 0x14f PF: > { %p1385_p13 = scmp.ge.s32.totalorder %s1586_s17, 2  ;;  %s1025_s20 = sand.u32 1, %s1566_s12  }
 0x150   : > { %s1026_s22 = scalar_lea.sflag [#allocation4], %s1025_s20 }
 0x151   : > { %p1379_p0 = pnand %p1385_p13, %p1662_p6 }
 0x153   : > { %p1380_p5 = pneg %p1379_p0 }
 0x155   : > { %1561 = dma.done.wait (%p1380_p5), %s1026_s22, 8192  }
 0x156   : > { %1563 = vsyncadd (%p1380_p5), %s1026_s22, 4294959104  ;;  %s20_s17 = sadd.s32 1, %s1586_s17   ;;  %s1952_s12 = smov %s1570_s13 }
 0x157   : > { %p17_p7 = scmp.ge.s32.totalorder %s20_s17, 6   ;;  %s1953_s13 = smov %s1574_s14 }
 0x158   : > { %s1954_s14 = smov %s1703_s18  ;;  %s1955_s15 = smov %s1582_s16 }
 0x159   : > { %s1956_s16 = smov %s1958_s5  ;;  %19 = sbr.rel (!%p17_p7) target bundleno = 9 (0x9), region = 85 }
 0x15e   :  { %1032 = vsyncpa [#allocation3], 1 }
 0x15f   :  { %1034 = vsyncpa [#allocation3 + $0x1], 1 }
 0x160   :  { %1035 = vsyncpa [#allocation6], 1 }
 0x161   :  { %1036 = vsyncpa [#allocation4], 1 }
 0x162   :  { %1038 = vsyncpa [#allocation4 + $0x1], 1 }

</bundles_post_ra>
